<compile_context>
chip_gen: v7x
topology: tpu7x:2x2x1
jax: 0.10.0
libtpu: 0.0.40
codegen_flags: <defaults>
</compile_context>

<pallas_src>
import functools
import math

import jax
import jax.numpy as jnp
from jax.experimental import pallas as pl
from jax.experimental.pallas import tpu as pltpu


# ----------------------------------------------------------------------------
# One-time probe: resolve pltpu.roll's rotation direction on this device.
# ----------------------------------------------------------------------------
@functools.lru_cache(maxsize=None)
def _roll_sign():
    """Returns +1 if pltpu.roll follows np.roll's convention, else -1.

    The in-kernel im2col relies on static lane rolls; probing the direction
    once on the actual device/toolchain makes the generated shifts robust to
    the primitive's sign convention.  Result is a cached Python int; it is
    primed in __main__ before jit (ensure_compile_time_eval keeps it working
    even if first touched while tracing).
    """
    def probe(x_ref, o_ref):
        o_ref[...] = pltpu.roll(x_ref[...], 1, 1)

    with jax.ensure_compile_time_eval():
        x = jnp.broadcast_to(jnp.arange(128, dtype=jnp.int32), (8, 128))
        out = pl.pallas_call(
            probe, out_shape=jax.ShapeDtypeStruct((8, 128), jnp.int32))(x)
        np_convention = int(out[0, 1]) == 0       # element 0 moved to index 1
    return 1 if np_convention else -1


# ----------------------------------------------------------------------------
# Fused Pallas kernel: on-chip im2col + 3 dilated-conv branches + 1x1 merge
# ----------------------------------------------------------------------------
def _as3_kernel(x_ref, coord_ref, wb_ref, wo_ref, bias_ref,     # inputs
                o_ref,                                          # output
                taps_ref, cat_ref,                              # VMEM scratch
                *, C, H, W, slope, roll_sign):
    L = x_ref.shape[2]                      # lanes = block_n * H * W
    x = x_ref[0]                            # (C, L) bf16, lane = n*HW + h*W + w

    # Pixel coordinates, broadcast once (hoisted: JAX does not CSE broadcasts).
    h_idx = jnp.broadcast_to(coord_ref[0:1, :], (C, L))          # int32
    w_idx = jnp.broadcast_to(coord_ref[1:2, :], (C, L))

    def branch(idx, d):
        # On-chip im2col for dilation d: 9 lane rolls + border masks into the
        # (9C, L) scratch (XLU/VPU work), then ONE deep K=9C MXU matmul.
        # Rolls are circular over the whole lane axis; every position where a
        # roll crosses an image/row boundary is exactly a masked (zero-pad)
        # position, so batching images along lanes stays correct.
        for kh in range(3):
            dh = (kh - 1) * d
            mh = None if dh == 0 else ((h_idx >= -dh) & (h_idx < H - dh))
            for kw in range(3):
                dw = (kw - 1) * d
                mw = None if dw == 0 else ((w_idx >= -dw) & (w_idx < W - dw))
                m = mh if mw is None else (mw if mh is None else (mh & mw))
                s = dh * W + dw              # flat-lane source offset
                tap = x if s == 0 else pltpu.roll(x, (-roll_sign * s) % L, 1)
                if m is not None:
                    tap = jnp.where(m, tap, jnp.zeros_like(tap))
                t = kh * 3 + kw
                taps_ref[t * C:(t + 1) * C, :] = tap

        acc = jnp.dot(wb_ref[idx * C:(idx + 1) * C, :], taps_ref[...],
                      preferred_element_type=jnp.float32)        # (C, L) f32
        acc = acc + bias_ref[:, idx:idx + 1]                     # lane bcast
        acc = jnp.where(acc >= 0.0, acc, acc * slope)            # LeakyReLU f32
        cat_ref[idx * C:(idx + 1) * C, :] = acc.astype(jnp.bfloat16)

    branch(0, 1)
    branch(1, 3)
    branch(2, 6)

    # Fused 1x1 merge: a single K=3C matmul over the concatenated branches.
    acc = jnp.dot(wo_ref[...], cat_ref[...], preferred_element_type=jnp.float32)
    acc = acc + bias_ref[:, 3:4]
    o_ref[0] = jnp.maximum(acc, 0.0)                             # ReLU, f32 vst


# ----------------------------------------------------------------------------
# Wrapper: BN folding, operand packing, one pallas_call for the whole module
# ----------------------------------------------------------------------------
def _fold_bn(conv_p, bn_p, eps=1e-5):
    scale = bn_p["gamma"] / jnp.sqrt(bn_p["var"] + eps)          # (Cout,)
    w = conv_p["w"] * scale[:, None, None, None]                 # OIHW
    b = conv_p["b"] * scale + bn_p["beta"] - bn_p["mean"] * scale
    return w, b


def _default_block_n(n):
    # Keep >=2 grid steps so v7x's "parallel" axis spans both TensorCores,
    # while folding the rest of the batch into lanes for single-TC v5e/v6e
    # (wider matmul RHS, fewer per-step overheads).  Cap keeps per-step VMEM
    # (~0.25 MiB/image + double-buffered I/O) well inside v7x's 64 MiB.
    if n <= 2:
        return 1
    return min((n + 1) // 2, 32)


def as3_forward(params, x, *, block_n=None):
    """AS3_128 forward.  x: (N, C, H, W) f32 -> (N, C, H, W) f32."""
    N, C, H, W = x.shape
    HW = H * W

    w1, b1 = _fold_bn(params["c1"], params["b1"])
    w2, b2 = _fold_bn(params["c2"], params["b2"])
    w3, b3 = _fold_bn(params["c3"], params["b3"])
    wo, bo = _fold_bn(params["co"], params["bo"])                # (C, 3C, 1, 1)

    if block_n is None:
        block_n = _default_block_n(N)
    G = -(-N // block_n)                    # grid steps
    Np = G * block_n
    L = block_n * HW                        # lanes per step (batch folded in)

    # Branch weights OIHW -> (O, 9*I), tap-major columns (kh*3+kw)*C + ci,
    # all three branches stacked into one (3C, 9C) operand.
    def wmat(wt):
        o, i = wt.shape[0], wt.shape[1]
        return jnp.transpose(wt, (0, 2, 3, 1)).reshape(o, 9 * i)

    wb = jnp.concatenate([wmat(w1), wmat(w2), wmat(w3)],
                         axis=0).astype(jnp.bfloat16)            # (3C, 9C)
    wom = wo.reshape(C, 3 * C).astype(jnp.bfloat16)              # 1x1 merge
    biases = jnp.stack([b1, b2, b3, bo], axis=1).astype(jnp.float32)   # (C, 4)

    # Activations NCHW -> (G, C, block_n*HW): channels on sublanes, batch on
    # lanes (lane = n*HW + h*W + w).  For block_n == 1 this is a pure reshape.
    xp = x if Np == N else jnp.pad(x, ((0, Np - N), (0, 0), (0, 0), (0, 0)))
    xl = (xp.reshape(G, block_n, C, HW)
            .transpose(0, 2, 1, 3)
            .reshape(G, C, L)
            .astype(jnp.bfloat16))

    # Per-lane pixel coordinates (h, w) for the in-kernel border masks.
    pix = jnp.arange(L, dtype=jnp.int32) % HW
    coords = jnp.stack([pix // W, pix % W], axis=0)              # (2, L) int32

    kernel = functools.partial(_as3_kernel, C=C, H=H, W=W,
                               slope=0.01,                       # LeakyReLU default
                               roll_sign=_roll_sign())
    out = pl.pallas_call(
        kernel,
        out_shape=jax.ShapeDtypeStruct((G, C, L), jnp.float32),
        grid=(G,),
        in_specs=[
            pl.BlockSpec((1, C, L), lambda g: (g, 0, 0)),        # activations
            pl.BlockSpec((2, L), lambda g: (0, 0)),              # pixel coords
            pl.BlockSpec((3 * C, 9 * C), lambda g: (0, 0)),      # branch weights
            pl.BlockSpec((C, 3 * C), lambda g: (0, 0)),          # 1x1 weight
            pl.BlockSpec((C, 4), lambda g: (0, 0)),              # biases
        ],
        out_specs=pl.BlockSpec((1, C, L), lambda g: (g, 0, 0)),
        scratch_shapes=[pltpu.VMEM((9 * C, L), jnp.bfloat16),    # im2col taps
                        pltpu.VMEM((3 * C, L), jnp.bfloat16)],   # cat(b1,b2,b3)
        compiler_params=pltpu.CompilerParams(
            dimension_semantics=("parallel",),                   # v7x: 2 TCs
            vmem_limit_bytes=32 * 1024 * 1024),
    )(xl, coords, wb, wom, biases)

    out = (out.reshape(G, C, block_n, HW)
              .transpose(0, 2, 1, 3)
              .reshape(Np, C, H, W))
    return out[:N]


# ----------------------------------------------------------------------------
# Pure-JAX f32 reference (for correctness check)
# ----------------------------------------------------------------------------
def as3_reference(params, x):
    w1, b1 = _fold_bn(params["c1"], params["b1"])
    w2, b2 = _fold_bn(params["c2"], params["b2"])
    w3, b3 = _fold_bn(params["c3"], params["b3"])
    wo, bo = _fold_bn(params["co"], params["bo"])

    def conv(xx, w, b, d):
        y = jax.lax.conv_general_dilated(
            xx, w, window_strides=(1, 1), padding=((d, d), (d, d)),
            rhs_dilation=(d, d), dimension_numbers=("NCHW", "OIHW", "NCHW"))
        return y + b[None, :, None, None]

    lrelu = lambda t: jnp.where(t >= 0.0, t, 0.01 * t)
    o1 = lrelu(conv(x, w1, b1, 1))
    o2 = lrelu(conv(x, w2, b2, 3))
    o3 = lrelu(conv(x, w3, b3, 6))
    cat = jnp.concatenate([o1, o2, o3], axis=1)
    y = jax.lax.conv_general_dilated(
        cat, wo, window_strides=(1, 1), padding=((0, 0), (0, 0)),
        dimension_numbers=("NCHW", "OIHW", "NCHW"))
    return jnp.maximum(y + bo[None, :, None, None], 0.0)


# ----------------------------------------------------------------------------
# Deterministic parameter construction (PyTorch layouts / default BN init)
# ----------------------------------------------------------------------------
class ParamGen:
    def __init__(self, key):
        self._key = key
        self._ctr = 0

    def take(self, shape, scale=0.1):
        k = jax.random.fold_in(self._key, self._ctr)
        self._ctr += 1
        return scale * jax.random.normal(k, shape, jnp.float32)


def make_as3_params(pg, c):
    def conv(cin, cout, k):
        fan_in = float(cin * k * k)
        return {"w": pg.take((cout, cin, k, k), scale=1.0 / math.sqrt(fan_in)),
                "b": pg.take((cout,), scale=0.01)}

    def bn(ch):  # PyTorch default init (eval-mode running stats)
        return {"gamma": jnp.ones((ch,), jnp.float32),
                "beta": jnp.zeros((ch,), jnp.float32),
                "mean": jnp.zeros((ch,), jnp.float32),
                "var": jnp.ones((ch,), jnp.float32)}

    return {"c1": conv(c, c, 3), "b1": bn(c),
            "c2": conv(c, c, 3), "b2": bn(c),
            "c3": conv(c, c, 3), "b3": bn(c),
            "co": conv(3 * c, c, 1), "bo": bn(c)}


# ----------------------------------------------------------------------------
if __name__ == "__main__":
    key = jax.random.PRNGKey(0)
    kx, kp = jax.random.split(key)

    N, C, H, W = 2, 32, 16, 16          # AS3_128 is used with channel=32
    x = jax.random.normal(kx, (N, C, H, W), jnp.float32)
    params = make_as3_params(ParamGen(kp), C)

    _roll_sign()                        # resolve roll convention outside jit

    fwd = jax.jit(as3_forward)
    out = jax.block_until_ready(fwd(params, x))

    assert out.shape == (N, C, H, W), out.shape
    assert bool(jnp.isfinite(out).all())

    ref = as3_reference(params, x)
    err = float(jnp.max(jnp.abs(out - ref)))
    # bf16 matmul operands with f32 accumulation -> typical max abs error vs
    # the f32 reference is ~1e-2; tolerance kept from the accepted version.
    assert bool(jnp.allclose(out, ref, rtol=1e-1, atol=1e-1)), (
        "max abs err = %f" % err)

    print("KERNEL_OK")
</pallas_src>

<mosaic_0001>
module attributes {stable_mosaic.version = 11 : i64} {
  func.func @probe(%arg0: memref<8x128xi32, #tpu.memory_space<vmem>>, %arg1: memref<8x128xi32, #tpu.memory_space<vmem>>) attributes {dimension_semantics = [], scalar_prefetch = 0 : i64, scratch_operands = 0 : i64, tpu.core_type = #tpu.core_type<tc>} {
    %c0 = arith.constant 0 : index
    %c0_0 = arith.constant 0 : index
    %0 = vector.load %arg0[%c0, %c0_0] : memref<8x128xi32, #tpu.memory_space<vmem>>, vector<8x128xi32>
    %c1_i32 = arith.constant 1 : i32
    %1 = tpu.dynamic_rotate %0 by %c1_i32 dim 1 : vector<8x128xi32>, i32 -> vector<8x128xi32>
    %c0_1 = arith.constant 0 : index
    %c0_2 = arith.constant 0 : index
    %2 = vector.load %arg1[%c0_1, %c0_2] : memref<8x128xi32, #tpu.memory_space<vmem>>, vector<8x128xi32>
    tpu.vector_store %arg1[%c0_1, %c0_2], %1 {strides = array<i32>} : memref<8x128xi32, #tpu.memory_space<vmem>>, vector<8x128xi32>,
    return
  }
}

</mosaic_0001>

<bundles_post_ra>
// kernel: tpu_custom_call.1
= control target key start
LH: loop header
LB: loop body
LE: loop exit
PB: predicated region body
PF: predicated region fallthrough
CT: control target
= control target key end

     0   :  { %6 = vsyncpa [#allocation3], 0  ;;  %s128_s0 = inlined_call_operand.hbm [shape: s32[8,128], index: 0, kind: input, shape index: {}]   ;;  %s129_s1 = inlined_call_operand.hbm [shape: s32[8,128], index: 1, kind: output, shape index: {}]  }
   0x1   :  { %7 = vsyncpa [#allocation4], 0  ;;  %s91_s6 = smov [#allocation2]   ;;  %s43_s10 = scalar_lea.hbm %s128_s0, 128 }
   0x2   :  { %s14_s7 = sshll.u32 %s91_s6, 4  ;;  %p44_p0 = scmp.ne.s32.totalorder %s128_s0, %s43_s10  ;;  %s15_s7 = int_to_ptr.vmem [resolvable:$true] %s14_s7 }
   0x3   :  { %p47_p1 = scmp.lt.u32.totalorder %s43_s10, %s128_s0 }
   0x5   :  { %p49_p2 = pnand %p47_p1, %p44_p0 }
   0x7   :  { %52 = shalt.err (!%p49_p2)
}
   0x8   :  { %s53_s15 = scalar_lea.vmem %s15_s7, 128  ;;  %p58_p4 = scmp.lt.s32.totalorder %s15_s7, %s15_s7 }
   0x9   :  { %p54_p3 = scmp.ne.s32.totalorder %s15_s7, %s53_s15  ;;  %p59_p5 = scmp.lt.s32.totalorder %s53_s15, %s53_s15 }
   0xb   :  { %p60_p6 = por %p59_p5, %p58_p4 }
   0xd   :  { %p61_p7 = pnand %p60_p6, %p54_p3 }
   0xf   :  { %64 = shalt.err (!%p61_p7)
}
  0x10   :  { %17 = dma.hbm_to_vmem [thread:$0]  %s128_s0, 128, %s15_s7, [#allocation3]  }
  0x11   :  { %87 = dma.done.wait [#allocation3], 128  }
  0x12   :  { %88 = vsyncadd [#allocation3], 4294967168  ;;  %v21_v0 = vld [vmem:[#allocation2] sm:$0xff]  ;;  %s92_s18 = smov 1   ;;  %s93_s19 = smov [#allocation5]  }
  0x13   :  { %22 = vrot.lane.b32.xlu0 %v21_v0, %s92_s18  ;;  %s31_s20 = sshll.u32 %s93_s19, 4  ;;  %s32_s20 = int_to_ptr.vmem [resolvable:$true] %s31_s20 }
  0x14   :  { %s65_s21 = scalar_lea.vmem %s32_s20, 128  ;;  %p70_p9 = scmp.lt.s32.totalorder %s32_s20, %s32_s20 }
  0x15   :  { %p66_p8 = scmp.ne.s32.totalorder %s32_s20, %s65_s21  ;;  %p71_p10 = scmp.lt.s32.totalorder %s65_s21, %s65_s21 }
  0x17   :  { %p72_p11 = por %p71_p10, %p70_p9 }
  0x19   :  { %p73_p12 = pnand %p72_p11, %p66_p8 }
  0x85   :  { %v23_v1 = vpop.permute.xlu0 %22 }
  0x86   :  { %24 = vst [vmem:[#allocation5] sm:$0xff] %v23_v1 }
  0x87   :  { %76 = shalt.err (!%p73_p12)
}
  0x88   :  { %s77_s0 = scalar_lea.hbm %s129_s1, 128 }
  0x89   :  { %p78_p13 = scmp.ne.s32.totalorder %s129_s1, %s77_s0  ;;  %p81_p0 = scmp.lt.u32.totalorder %s77_s0, %s129_s1 }
  0x8b   :  { %p83_p1 = pnand %p81_p0, %p78_p13 }
  0x8d   :  { %86 = shalt.err (!%p83_p1)
}
  0x8e   :  { %34 = dma.vmem_to_hbm [thread:$0]  %s32_s20, 128, %s129_s1, [#allocation4]  }
  0x8f   :  { %89 = dma.done.wait [#allocation4], 128  }
  0x90   :  { %90 = vsyncadd [#allocation4], 4294967168 }
  0x91   :  { %38 = vsyncpa [#allocation3], 1 }
  0x92   :  { %39 = vsyncpa [#allocation4], 1 }

</bundles_post_ra>
